<compile_context>
chip_gen: v7x
topology: tpu7x:2x2x1
jax: 0.10.0
libtpu: 0.0.40
codegen_flags: <defaults>
</compile_context>

<pallas_src>
import functools
import math

import numpy as np
import jax
import jax.numpy as jnp
from jax.experimental import pallas as pl
from jax.experimental.pallas import tpu as pltpu


def _dft_matrix(n, inverse):
    """Symmetric DFT matrix W[j, k] = exp(-+2*pi*i*j*k/N) (inverse has 1/N)."""
    k = np.arange(n)
    sign = 2j if inverse else -2j
    w = np.exp(sign * np.pi * np.outer(k, k) / n)
    if inverse:
        w = w / n
    return w                       # complex128, symmetric


def _stage2(tr, ti, kr, ki, ks, *, nb, R, D3, cdt):
    """Stage 2:  Y^T = T^T @ kron(F1, F2)   (Kronecker factor is symmetric).

    A single batched swapaxes (one XLU relayout) replaces the old per-batch
    slice/.T/concatenate Python loop, then one big 2-D matmul keeps the large
    R axis on the MXU lane/output axis so the output store is lane-dense.
    """
    ttr = jnp.swapaxes(tr.reshape(nb, R, D3), 1, 2).reshape(nb * D3, R)
    tti = jnp.swapaxes(ti.reshape(nb, R, D3), 1, 2).reshape(nb * D3, R)
    # Gauss 3-mult complex product (3 matmuls + VPU adds instead of 4).
    n1 = jnp.dot(ttr.astype(cdt), kr, preferred_element_type=jnp.float32)
    n2 = jnp.dot(tti.astype(cdt), ki, preferred_element_type=jnp.float32)
    n3 = jnp.dot((ttr + tti).astype(cdt), ks, preferred_element_type=jnp.float32)
    return n1 - n2, n3 - n1 - n2


def _dft3d_merge_kernel(xr_ref, xi_ref, f3r_ref, f3i_ref, f3s_ref,
                        kr_ref, ki_ref, ks_ref, yr_ref, yi_ref,
                        *, nb, R, D3, cdt):
    """Complex-input 3-D DFT block: Y^T = (X @ F3)^T @ kron(F1, F2)."""
    xr = xr_ref[...]                                   # (nb*R, D3) compute dtype
    xi = xi_ref[...]
    # Stage 1: T = X @ F3 along D3 -- one big matmul per term, Gauss 3-mult.
    m1 = jnp.dot(xr, f3r_ref[...], preferred_element_type=jnp.float32)
    m2 = jnp.dot(xi, f3i_ref[...], preferred_element_type=jnp.float32)
    m3 = jnp.dot(xr + xi, f3s_ref[...], preferred_element_type=jnp.float32)
    tr = m1 - m2                                       # (nb*R, D3) float32
    ti = m3 - m1 - m2
    yr, yi = _stage2(tr, ti, kr_ref[...], ki_ref[...], ks_ref[...],
                     nb=nb, R=R, D3=D3, cdt=cdt)
    yr_ref[...] = yr                                   # lane-dense (nb*D3, R) store
    yi_ref[...] = yi


def _dft3d_split_kernel(x_ref, f3r_ref, f3i_ref, kr_ref, ki_ref, ks_ref,
                        yr_ref, yi_ref, *, nb, R, D3, cdt):
    """Real-input 3-D DFT block: the zero imaginary plane is never read."""
    x = x_ref[...]                                     # (nb*R, D3) compute dtype
    tr = jnp.dot(x, f3r_ref[...], preferred_element_type=jnp.float32)
    ti = jnp.dot(x, f3i_ref[...], preferred_element_type=jnp.float32)
    yr, yi = _stage2(tr, ti, kr_ref[...], ki_ref[...], ks_ref[...],
                     nb=nb, R=R, D3=D3, cdt=cdt)
    yr_ref[...] = yr
    yi_ref[...] = yi


def _vmem_capacity_bytes():
    """Physical VMEM per TensorCore; conservative fallback = v7x (64 MiB)."""
    try:
        cap = int(pltpu.get_tpu_info().vmem_capacity_bytes)
        if cap > 0:
            return cap
    except Exception:
        pass
    return 64 * 2**20


def _per_batch_bytes(R, D3, n_in, cdt_bytes):
    """Per-batch VMEM working set: I/O double-buffers + f32 intermediates."""
    return (n_in * 2 * R * D3 * cdt_bytes       # input planes, 2 pipeline bufs
            + 2 * 2 * R * D3 * 4                # f32 output planes, 2 bufs
            + 10 * R * D3 * 4)                  # live f32 intermediates in-kernel


def _pick_batch_block(B, R, D3, n_in, cdt_bytes, budget):
    """Largest nb (batches per grid step) fitting the generation-aware budget."""
    twiddles = 2 * (3 * D3 * D3 + 3 * R * R) * cdt_bytes   # worst case: 2 bufs
    per_batch = _per_batch_bytes(R, D3, n_in, cdt_bytes)
    nb = (budget - twiddles) // per_batch
    return int(max(1, min(B, nb)))


def _dft3d(xr, xi, *, inverse, compute_dtype):
    """3-D (i)DFT over the last three axes of (B, D1, D2, D3) float32 planes.

    xi may be None (real input).  Returns (yr, yi) float32 planes.
    """
    B, D1, D2, D3 = xr.shape
    R = D1 * D2
    cdt = np.dtype(compute_dtype)
    n_in = 1 if xi is None else 2

    cap = _vmem_capacity_bytes()
    budget = cap // 2                     # working-set budget (32 MiB v7x, 64 MiB v5e/v6e)
    limit_cap = (cap * 3) // 4            # never request more scoped VMEM than this

    # Generation-aware guard for the dense (R, R) Kronecker stage-2 factor.
    # TODO(synk): tile the R output axis (second "parallel" grid dim with
    # (R, R_tile) twiddle blocks) to support larger R, especially on v7x.
    if 2 * 3 * R * R * cdt.itemsize > (budget * 3) // 5:
        raise NotImplementedError(
            "D1*D2 too large for the dense Kronecker DFT factor on this chip; "
            "needs an R-tiled / separable stage-2 path.")

    # Twiddle factors, built on the host in float64 and cast once.
    f1 = _dft_matrix(D1, inverse)
    f2 = _dft_matrix(D2, inverse)
    f3 = _dft_matrix(D3, inverse)
    # Row flattening r = d1*D2 + d2 (d2 fastest) matches kron(f1, f2); the
    # Kronecker product of symmetric DFT matrices is itself symmetric.
    kk = np.kron(f1, f2)
    f3r = jnp.asarray(f3.real, cdt)
    f3i = jnp.asarray(f3.imag, cdt)
    f3s = jnp.asarray(f3.real + f3.imag, cdt)     # Gauss-trick sum factor
    kr = jnp.asarray(kk.real, cdt)
    ki = jnp.asarray(kk.imag, cdt)
    ks = jnp.asarray(kk.real + kk.imag, cdt)

    # Batch blocking: nb batches per grid step, sized to the chip's VMEM.
    nb = _pick_batch_block(B, R, D3, n_in, cdt.itemsize, budget)
    if B >= 2:
        # Keep >= 2 grid steps so the "parallel" axis shards across both v7x
        # TensorCores; near-zero cost on single-TC chips.
        nb = min(nb, -(-B // 2))
    grid_b = -(-B // nb)
    if grid_b > 1:
        # Multi-step blocks must keep sublane dims (nb*R, nb*D3) 8-aligned.
        r1 = 8 // math.gcd(8, R)
        r2 = 8 // math.gcd(8, D3)
        step = r1 * r2 // math.gcd(r1, r2)
        nb_aligned = (nb // step) * step
        nb = nb_aligned if nb_aligned >= 1 else B   # fallback: single grid step
        grid_b = -(-B // nb)
    B_pad = grid_b * nb

    def to_rows(a):
        # Cast to the MXU compute dtype on the host: halves the kernel's input
        # DMA bytes and the input double-buffer VMEM (cast fuses with the pad).
        a = a.reshape(B, R, D3).astype(cdt)
        if B_pad != B:
            a = jnp.pad(a, ((0, B_pad - B), (0, 0), (0, 0)))
        return a.reshape(B_pad * R, D3)

    out_shape = (jax.ShapeDtypeStruct((B_pad * D3, R), jnp.float32),
                 jax.ShapeDtypeStruct((B_pad * D3, R), jnp.float32))

    # Honest scoped-VMEM estimate: I/O buffers + twiddles (worst-case two
    # buffers) + in-kernel f32 intermediates; cap per chip generation.
    twiddle_bytes = (3 * D3 * D3 + 3 * R * R) * cdt.itemsize
    est = 2 * twiddle_bytes + nb * _per_batch_bytes(R, D3, n_in, cdt.itemsize)
    params = dict(dimension_semantics=("parallel",))
    if est > 24 * 2**20:
        params["vmem_limit_bytes"] = int(min(max(int(est * 1.4), 32 * 2**20),
                                             limit_cap))
    compiler_params = pltpu.CompilerParams(**params)

    if xi is None:
        kernel = functools.partial(_dft3d_split_kernel, nb=nb, R=R, D3=D3, cdt=cdt)
        args = (to_rows(xr), f3r, f3i, kr, ki, ks)
        n_tw33, n_twRR = 2, 3
    else:
        kernel = functools.partial(_dft3d_merge_kernel, nb=nb, R=R, D3=D3, cdt=cdt)
        args = (to_rows(xr), to_rows(xi), f3r, f3i, f3s, kr, ki, ks)
        n_tw33, n_twRR = 3, 3

    x_spec = pl.BlockSpec((nb * R, D3), lambda g: (g, 0))
    y_spec = pl.BlockSpec((nb * D3, R), lambda g: (g, 0))      # lane-dense out

    def call(single_buffer_twiddles):
        # Twiddle inputs have constant index_maps -> no re-DMA between grid
        # steps; single-buffering them halves their VMEM footprint.
        tw_kw = ({"pipeline_mode": pl.Buffered(1)}
                 if single_buffer_twiddles else {})
        c33 = pl.BlockSpec((D3, D3), lambda g: (0, 0), **tw_kw)
        cRR = pl.BlockSpec((R, R), lambda g: (0, 0), **tw_kw)
        in_specs = [x_spec] * n_in + [c33] * n_tw33 + [cRR] * n_twRR
        return pl.pallas_call(
            kernel,
            grid=(grid_b,),
            in_specs=in_specs,
            out_specs=(y_spec, y_spec),
            out_shape=out_shape,
            compiler_params=compiler_params,
        )(*args)

    try:
        ytr, yti = call(True)
    except Exception:
        # Portability fallback if Buffered(1) is rejected by this lowering.
        ytr, yti = call(False)

    def from_rows(yt):
        # (B_pad*D3, R) -> (B, D1, D2, D3).  One XLA relayout pass; it cannot
        # be dropped without changing the module's output layout contract
        # (torch.fft returns (..., D1, D2, D3)).
        y = yt.reshape(B_pad, D3, R)[:B]
        return jnp.transpose(y, (0, 2, 1)).reshape(B, D1, D2, D3)

    return from_rows(ytr), from_rows(yti)


class Fourier3dCustom:
    """JAX/Pallas port of the PyTorch ``Fourier3dCustom`` module.

    split=False (default): inputs are (real, imag) planes; returns the complex
    ifftn over the last three axes (like torch.fft.ifftn).
    split=True: returns (real, imag) of the fftn of the input.

    MXU inputs default to bfloat16 with float32 accumulation (within the
    module's ~1e-2 tolerance and the efficient path on v5e's MXU); pass
    compute_dtype=jnp.float32 for full-precision twiddles.
    """

    def __init__(self, **kwargs):
        self.split = kwargs.get("split", False)
        self.compute_dtype = kwargs.get("compute_dtype", jnp.bfloat16)

    def __call__(self, inputs):
        return self.fourier_split(inputs) if self.split else self.fourier_merge(inputs)

    def fourier_split(self, inputs):
        x = jnp.asarray(inputs)
        if jnp.iscomplexobj(x):
            yr, yi = _dft3d(jnp.real(x).astype(jnp.float32),
                            jnp.imag(x).astype(jnp.float32),
                            inverse=False, compute_dtype=self.compute_dtype)
        else:
            # Real input: the all-zero imaginary plane is never built or read.
            yr, yi = _dft3d(x.astype(jnp.float32), None,
                            inverse=False, compute_dtype=self.compute_dtype)
        return (yr, yi)

    def fourier_merge(self, inputs):
        real, imag = inputs[0], inputs[1]
        yr, yi = _dft3d(jnp.asarray(real, jnp.float32),
                        jnp.asarray(imag, jnp.float32),
                        inverse=True, compute_dtype=self.compute_dtype)
        return yr + 1j * yi          # complex64, like torch.fft.ifftn output


if __name__ == "__main__":
    key = jax.random.PRNGKey(0)
    k1, k2 = jax.random.split(key)
    B, D1, D2, D3 = 2, 4, 8, 16
    real = jax.random.normal(k1, (B, D1, D2, D3), jnp.float32)
    imag = jax.random.normal(k2, (B, D1, D2, D3), jnp.float32)

    ref_fwd = np.fft.fftn(np.asarray(real), axes=(-3, -2, -1))
    ref_inv = np.fft.ifftn(np.asarray(real) + 1j * np.asarray(imag),
                           axes=(-3, -2, -1))

    def check(got, want, tol):
        got = np.asarray(got)
        want = np.asarray(want)
        err = np.max(np.abs(got - want))
        scale = np.max(np.abs(want))
        assert err <= tol * scale + 1e-6, (err, tol * scale)

    # float32 twiddles / MXU inputs: tight check.
    merge32 = Fourier3dCustom(compute_dtype=jnp.float32)
    split32 = Fourier3dCustom(split=True, compute_dtype=jnp.float32)
    out32 = jax.block_until_ready(merge32((real, imag)))
    check(out32, ref_inv, 2e-2)
    sr32, si32 = jax.block_until_ready(split32(real))
    check(np.asarray(sr32) + 1j * np.asarray(si32), ref_fwd, 2e-2)

    # Default bfloat16 MXU inputs with float32 accumulation: looser check.
    # TODO(synk): for large D1*D2*D3, keep the (R,R) stage-2 twiddles in f32
    # if the Gauss-trick cancellation pushes bf16 error past tolerance.
    merge_bf = Fourier3dCustom()
    split_bf = Fourier3dCustom(split=True)
    out_bf = jax.block_until_ready(merge_bf((real, imag)))
    check(out_bf, ref_inv, 5e-2)
    sr_bf, si_bf = jax.block_until_ready(split_bf(real))
    check(np.asarray(sr_bf) + 1j * np.asarray(si_bf), ref_fwd, 5e-2)

    print("KERNEL_OK")
</pallas_src>

<mosaic_0001>
module attributes {stable_mosaic.version = 11 : i64} {
  func.func @_dft3d_merge_kernel(%arg0: i32, %arg1: memref<32x16xf32, #tpu.memory_space<vmem>>, %arg2: memref<32x16xf32, #tpu.memory_space<vmem>>, %arg3: memref<16x16xf32, #tpu.memory_space<vmem>>, %arg4: memref<16x16xf32, #tpu.memory_space<vmem>>, %arg5: memref<16x16xf32, #tpu.memory_space<vmem>>, %arg6: memref<32x32xf32, #tpu.memory_space<vmem>>, %arg7: memref<32x32xf32, #tpu.memory_space<vmem>>, %arg8: memref<32x32xf32, #tpu.memory_space<vmem>>, %arg9: memref<16x32xf32, #tpu.memory_space<vmem>>, %arg10: memref<16x32xf32, #tpu.memory_space<vmem>>) attributes {dimension_semantics = [#tpu.dimension_semantics<parallel>], iteration_bounds = array<i64: 2>, scalar_prefetch = 0 : i64, scratch_operands = 0 : i64, tpu.core_type = #tpu.core_type<tc>, window_params = [{transform_indices = @transform_0, window_bounds = array<i64: 32, 16>}, {transform_indices = @transform_1, window_bounds = array<i64: 32, 16>}, {pipeline_mode = #tpu.pipeline_mode<synchronous>, transform_indices = @transform_2, window_bounds = array<i64: 16, 16>}, {pipeline_mode = #tpu.pipeline_mode<synchronous>, transform_indices = @transform_3, window_bounds = array<i64: 16, 16>}, {pipeline_mode = #tpu.pipeline_mode<synchronous>, transform_indices = @transform_4, window_bounds = array<i64: 16, 16>}, {pipeline_mode = #tpu.pipeline_mode<synchronous>, transform_indices = @transform_5, window_bounds = array<i64: 32, 32>}, {pipeline_mode = #tpu.pipeline_mode<synchronous>, transform_indices = @transform_6, window_bounds = array<i64: 32, 32>}, {pipeline_mode = #tpu.pipeline_mode<synchronous>, transform_indices = @transform_7, window_bounds = array<i64: 32, 32>}, {transform_indices = @transform_8, window_bounds = array<i64: 16, 32>}, {transform_indices = @transform_9, window_bounds = array<i64: 16, 32>}]} {
    %c0 = arith.constant 0 : index
    %c0_0 = arith.constant 0 : index
    %0 = vector.load %arg1[%c0, %c0_0] : memref<32x16xf32, #tpu.memory_space<vmem>>, vector<32x16xf32>
    %c0_1 = arith.constant 0 : index
    %c0_2 = arith.constant 0 : index
    %1 = vector.load %arg2[%c0_1, %c0_2] : memref<32x16xf32, #tpu.memory_space<vmem>>, vector<32x16xf32>
    %c0_3 = arith.constant 0 : index
    %c0_4 = arith.constant 0 : index
    %2 = vector.load %arg3[%c0_3, %c0_4] : memref<16x16xf32, #tpu.memory_space<vmem>>, vector<16x16xf32>
    %cst = arith.constant dense<0.000000e+00> : vector<32x16xf32>
    %3 = tpu.matmul %0, %2, %cst {dimension_numbers = #tpu.dot_dimension_numbers<[1], [0], [0], [1], [0, 0, 1, 1], [], []>} : vector<32x16xf32>, vector<16x16xf32>, vector<32x16xf32> -> vector<32x16xf32>
    %c0_5 = arith.constant 0 : index
    %c0_6 = arith.constant 0 : index
    %4 = vector.load %arg4[%c0_5, %c0_6] : memref<16x16xf32, #tpu.memory_space<vmem>>, vector<16x16xf32>
    %cst_7 = arith.constant dense<0.000000e+00> : vector<32x16xf32>
    %5 = tpu.matmul %1, %4, %cst_7 {dimension_numbers = #tpu.dot_dimension_numbers<[1], [0], [0], [1], [0, 0, 1, 1], [], []>} : vector<32x16xf32>, vector<16x16xf32>, vector<32x16xf32> -> vector<32x16xf32>
    %6 = arith.addf %0, %1 : vector<32x16xf32>
    %c0_8 = arith.constant 0 : index
    %c0_9 = arith.constant 0 : index
    %7 = vector.load %arg5[%c0_8, %c0_9] : memref<16x16xf32, #tpu.memory_space<vmem>>, vector<16x16xf32>
    %cst_10 = arith.constant dense<0.000000e+00> : vector<32x16xf32>
    %8 = tpu.matmul %6, %7, %cst_10 {dimension_numbers = #tpu.dot_dimension_numbers<[1], [0], [0], [1], [0, 0, 1, 1], [], []>} : vector<32x16xf32>, vector<16x16xf32>, vector<32x16xf32> -> vector<32x16xf32>
    %9 = arith.subf %3, %5 : vector<32x16xf32>
    %10 = arith.subf %8, %3 : vector<32x16xf32>
    %11 = arith.subf %10, %5 : vector<32x16xf32>
    %c0_11 = arith.constant 0 : index
    %c0_12 = arith.constant 0 : index
    %12 = vector.load %arg6[%c0_11, %c0_12] : memref<32x32xf32, #tpu.memory_space<vmem>>, vector<32x32xf32>
    %c0_13 = arith.constant 0 : index
    %c0_14 = arith.constant 0 : index
    %13 = vector.load %arg7[%c0_13, %c0_14] : memref<32x32xf32, #tpu.memory_space<vmem>>, vector<32x32xf32>
    %c0_15 = arith.constant 0 : index
    %c0_16 = arith.constant 0 : index
    %14 = vector.load %arg8[%c0_15, %c0_16] : memref<32x32xf32, #tpu.memory_space<vmem>>, vector<32x32xf32>
    %15 = vector.shape_cast %9 : vector<32x16xf32> to vector<1x32x16xf32>
    %16 = tpu.transpose %15, [0, 2, 1] : vector<1x32x16xf32> -> vector<1x16x32xf32>
    %17 = vector.shape_cast %16 : vector<1x16x32xf32> to vector<16x32xf32>
    %18 = vector.shape_cast %11 : vector<32x16xf32> to vector<1x32x16xf32>
    %19 = tpu.transpose %18, [0, 2, 1] : vector<1x32x16xf32> -> vector<1x16x32xf32>
    %20 = vector.shape_cast %19 : vector<1x16x32xf32> to vector<16x32xf32>
    %cst_17 = arith.constant dense<0.000000e+00> : vector<16x32xf32>
    %21 = tpu.matmul %17, %12, %cst_17 {dimension_numbers = #tpu.dot_dimension_numbers<[1], [0], [0], [1], [0, 0, 1, 1], [], []>} : vector<16x32xf32>, vector<32x32xf32>, vector<16x32xf32> -> vector<16x32xf32>
    %cst_18 = arith.constant dense<0.000000e+00> : vector<16x32xf32>
    %22 = tpu.matmul %20, %13, %cst_18 {dimension_numbers = #tpu.dot_dimension_numbers<[1], [0], [0], [1], [0, 0, 1, 1], [], []>} : vector<16x32xf32>, vector<32x32xf32>, vector<16x32xf32> -> vector<16x32xf32>
    %23 = arith.addf %17, %20 : vector<16x32xf32>
    %cst_19 = arith.constant dense<0.000000e+00> : vector<16x32xf32>
    %24 = tpu.matmul %23, %14, %cst_19 {dimension_numbers = #tpu.dot_dimension_numbers<[1], [0], [0], [1], [0, 0, 1, 1], [], []>} : vector<16x32xf32>, vector<32x32xf32>, vector<16x32xf32> -> vector<16x32xf32>
    %25 = arith.subf %21, %22 : vector<16x32xf32>
    %26 = arith.subf %24, %21 : vector<16x32xf32>
    %27 = arith.subf %26, %22 : vector<16x32xf32>
    %c0_20 = arith.constant 0 : index
    %c0_21 = arith.constant 0 : index
    %28 = vector.load %arg9[%c0_20, %c0_21] : memref<16x32xf32, #tpu.memory_space<vmem>>, vector<16x32xf32>
    tpu.vector_store %arg9[%c0_20, %c0_21], %25 {strides = array<i32>} : memref<16x32xf32, #tpu.memory_space<vmem>>, vector<16x32xf32>,
    %c0_22 = arith.constant 0 : index
    %c0_23 = arith.constant 0 : index
    %29 = vector.load %arg10[%c0_22, %c0_23] : memref<16x32xf32, #tpu.memory_space<vmem>>, vector<16x32xf32>
    tpu.vector_store %arg10[%c0_22, %c0_23], %27 {strides = array<i32>} : memref<16x32xf32, #tpu.memory_space<vmem>>, vector<16x32xf32>,
    return
  }
  func.func @transform_0(%arg0: i32) -> (i32, i32) {
    %c0_i32 = arith.constant 0 : i32
    %c0_i32_0 = arith.constant 0 : i32
    return %arg0, %c0_i32 : i32, i32
  }
  func.func @transform_1(%arg0: i32) -> (i32, i32) {
    %c0_i32 = arith.constant 0 : i32
    %c0_i32_0 = arith.constant 0 : i32
    return %arg0, %c0_i32 : i32, i32
  }
  func.func @transform_2(%arg0: i32) -> (i32, i32) {
    %c0_i32 = arith.constant 0 : i32
    %c0_i32_0 = arith.constant 0 : i32
    %c0_i32_1 = arith.constant 0 : i32
    return %c0_i32, %c0_i32_0 : i32, i32
  }
  func.func @transform_3(%arg0: i32) -> (i32, i32) {
    %c0_i32 = arith.constant 0 : i32
    %c0_i32_0 = arith.constant 0 : i32
    %c0_i32_1 = arith.constant 0 : i32
    return %c0_i32, %c0_i32_0 : i32, i32
  }
  func.func @transform_4(%arg0: i32) -> (i32, i32) {
    %c0_i32 = arith.constant 0 : i32
    %c0_i32_0 = arith.constant 0 : i32
    %c0_i32_1 = arith.constant 0 : i32
    return %c0_i32, %c0_i32_0 : i32, i32
  }
  func.func @transform_5(%arg0: i32) -> (i32, i32) {
    %c0_i32 = arith.constant 0 : i32
    %c0_i32_0 = arith.constant 0 : i32
    %c0_i32_1 = arith.constant 0 : i32
    return %c0_i32, %c0_i32_0 : i32, i32
  }
  func.func @transform_6(%arg0: i32) -> (i32, i32) {
    %c0_i32 = arith.constant 0 : i32
    %c0_i32_0 = arith.constant 0 : i32
    %c0_i32_1 = arith.constant 0 : i32
    return %c0_i32, %c0_i32_0 : i32, i32
  }
  func.func @transform_7(%arg0: i32) -> (i32, i32) {
    %c0_i32 = arith.constant 0 : i32
    %c0_i32_0 = arith.constant 0 : i32
    %c0_i32_1 = arith.constant 0 : i32
    return %c0_i32, %c0_i32_0 : i32, i32
  }
  func.func @transform_8(%arg0: i32) -> (i32, i32) {
    %c0_i32 = arith.constant 0 : i32
    %c0_i32_0 = arith.constant 0 : i32
    return %arg0, %c0_i32 : i32, i32
  }
  func.func @transform_9(%arg0: i32) -> (i32, i32) {
    %c0_i32 = arith.constant 0 : i32
    %c0_i32_0 = arith.constant 0 : i32
    return %arg0, %c0_i32 : i32, i32
  }
}

module attributes {stable_mosaic.version = 11 : i64} {
  func.func @_dft3d_merge_kernel(%arg0: i32, %arg1: memref<32x16xf32, #tpu.memory_space<vmem>>, %arg2: memref<32x16xf32, #tpu.memory_space<vmem>>, %arg3: memref<16x16xf32, #tpu.memory_space<vmem>>, %arg4: memref<16x16xf32, #tpu.memory_space<vmem>>, %arg5: memref<16x16xf32, #tpu.memory_space<vmem>>, %arg6: memref<32x32xf32, #tpu.memory_space<vmem>>, %arg7: memref<32x32xf32, #tpu.memory_space<vmem>>, %arg8: memref<32x32xf32, #tpu.memory_space<vmem>>, %arg9: memref<16x32xf32, #tpu.memory_space<vmem>>, %arg10: memref<16x32xf32, #tpu.memory_space<vmem>>) attributes {dimension_semantics = [#tpu.dimension_semantics<parallel>], iteration_bounds = array<i64: 2>, scalar_prefetch = 0 : i64, scratch_operands = 0 : i64, tpu.core_type = #tpu.core_type<tc>, window_params = [{transform_indices = @transform_0, window_bounds = array<i64: 32, 16>}, {transform_indices = @transform_1, window_bounds = array<i64: 32, 16>}, {pipeline_mode = #tpu.pipeline_mode<synchronous>, transform_indices = @transform_2, window_bounds = array<i64: 16, 16>}, {pipeline_mode = #tpu.pipeline_mode<synchronous>, transform_indices = @transform_3, window_bounds = array<i64: 16, 16>}, {pipeline_mode = #tpu.pipeline_mode<synchronous>, transform_indices = @transform_4, window_bounds = array<i64: 16, 16>}, {pipeline_mode = #tpu.pipeline_mode<synchronous>, transform_indices = @transform_5, window_bounds = array<i64: 32, 32>}, {pipeline_mode = #tpu.pipeline_mode<synchronous>, transform_indices = @transform_6, window_bounds = array<i64: 32, 32>}, {pipeline_mode = #tpu.pipeline_mode<synchronous>, transform_indices = @transform_7, window_bounds = array<i64: 32, 32>}, {transform_indices = @transform_8, window_bounds = array<i64: 16, 32>}, {transform_indices = @transform_9, window_bounds = array<i64: 16, 32>}]} {
    %c0 = arith.constant 0 : index
    %c0_0 = arith.constant 0 : index
    %0 = vector.load %arg1[%c0, %c0_0] : memref<32x16xf32, #tpu.memory_space<vmem>>, vector<32x16xf32>
    %c0_1 = arith.constant 0 : index
    %c0_2 = arith.constant 0 : index
    %1 = vector.load %arg2[%c0_1, %c0_2] : memref<32x16xf32, #tpu.memory_space<vmem>>, vector<32x16xf32>
    %c0_3 = arith.constant 0 : index
    %c0_4 = arith.constant 0 : index
    %2 = vector.load %arg3[%c0_3, %c0_4] : memref<16x16xf32, #tpu.memory_space<vmem>>, vector<16x16xf32>
    %cst = arith.constant dense<0.000000e+00> : vector<32x16xf32>
    %3 = tpu.matmul %0, %2, %cst {dimension_numbers = #tpu.dot_dimension_numbers<[1], [0], [0], [1], [0, 0, 1, 1], [], []>} : vector<32x16xf32>, vector<16x16xf32>, vector<32x16xf32> -> vector<32x16xf32>
    %c0_5 = arith.constant 0 : index
    %c0_6 = arith.constant 0 : index
    %4 = vector.load %arg4[%c0_5, %c0_6] : memref<16x16xf32, #tpu.memory_space<vmem>>, vector<16x16xf32>
    %cst_7 = arith.constant dense<0.000000e+00> : vector<32x16xf32>
    %5 = tpu.matmul %1, %4, %cst_7 {dimension_numbers = #tpu.dot_dimension_numbers<[1], [0], [0], [1], [0, 0, 1, 1], [], []>} : vector<32x16xf32>, vector<16x16xf32>, vector<32x16xf32> -> vector<32x16xf32>
    %6 = arith.addf %0, %1 : vector<32x16xf32>
    %c0_8 = arith.constant 0 : index
    %c0_9 = arith.constant 0 : index
    %7 = vector.load %arg5[%c0_8, %c0_9] : memref<16x16xf32, #tpu.memory_space<vmem>>, vector<16x16xf32>
    %cst_10 = arith.constant dense<0.000000e+00> : vector<32x16xf32>
    %8 = tpu.matmul %6, %7, %cst_10 {dimension_numbers = #tpu.dot_dimension_numbers<[1], [0], [0], [1], [0, 0, 1, 1], [], []>} : vector<32x16xf32>, vector<16x16xf32>, vector<32x16xf32> -> vector<32x16xf32>
    %9 = arith.subf %3, %5 : vector<32x16xf32>
    %10 = arith.subf %8, %3 : vector<32x16xf32>
    %11 = arith.subf %10, %5 : vector<32x16xf32>
    %c0_11 = arith.constant 0 : index
    %c0_12 = arith.constant 0 : index
    %12 = vector.load %arg6[%c0_11, %c0_12] : memref<32x32xf32, #tpu.memory_space<vmem>>, vector<32x32xf32>
    %c0_13 = arith.constant 0 : index
    %c0_14 = arith.constant 0 : index
    %13 = vector.load %arg7[%c0_13, %c0_14] : memref<32x32xf32, #tpu.memory_space<vmem>>, vector<32x32xf32>
    %c0_15 = arith.constant 0 : index
    %c0_16 = arith.constant 0 : index
    %14 = vector.load %arg8[%c0_15, %c0_16] : memref<32x32xf32, #tpu.memory_space<vmem>>, vector<32x32xf32>
    %15 = vector.shape_cast %9 : vector<32x16xf32> to vector<1x32x16xf32>
    %16 = tpu.transpose %15, [0, 2, 1] : vector<1x32x16xf32> -> vector<1x16x32xf32>
    %17 = vector.shape_cast %16 : vector<1x16x32xf32> to vector<16x32xf32>
    %18 = vector.shape_cast %11 : vector<32x16xf32> to vector<1x32x16xf32>
    %19 = tpu.transpose %18, [0, 2, 1] : vector<1x32x16xf32> -> vector<1x16x32xf32>
    %20 = vector.shape_cast %19 : vector<1x16x32xf32> to vector<16x32xf32>
    %cst_17 = arith.constant dense<0.000000e+00> : vector<16x32xf32>
    %21 = tpu.matmul %17, %12, %cst_17 {dimension_numbers = #tpu.dot_dimension_numbers<[1], [0], [0], [1], [0, 0, 1, 1], [], []>} : vector<16x32xf32>, vector<32x32xf32>, vector<16x32xf32> -> vector<16x32xf32>
    %cst_18 = arith.constant dense<0.000000e+00> : vector<16x32xf32>
    %22 = tpu.matmul %20, %13, %cst_18 {dimension_numbers = #tpu.dot_dimension_numbers<[1], [0], [0], [1], [0, 0, 1, 1], [], []>} : vector<16x32xf32>, vector<32x32xf32>, vector<16x32xf32> -> vector<16x32xf32>
    %23 = arith.addf %17, %20 : vector<16x32xf32>
    %cst_19 = arith.constant dense<0.000000e+00> : vector<16x32xf32>
    %24 = tpu.matmul %23, %14, %cst_19 {dimension_numbers = #tpu.dot_dimension_numbers<[1], [0], [0], [1], [0, 0, 1, 1], [], []>} : vector<16x32xf32>, vector<32x32xf32>, vector<16x32xf32> -> vector<16x32xf32>
    %25 = arith.subf %21, %22 : vector<16x32xf32>
    %26 = arith.subf %24, %21 : vector<16x32xf32>
    %27 = arith.subf %26, %22 : vector<16x32xf32>
    %c0_20 = arith.constant 0 : index
    %c0_21 = arith.constant 0 : index
    %28 = vector.load %arg9[%c0_20, %c0_21] : memref<16x32xf32, #tpu.memory_space<vmem>>, vector<16x32xf32>
    tpu.vector_store %arg9[%c0_20, %c0_21], %25 {strides = array<i32>} : memref<16x32xf32, #tpu.memory_space<vmem>>, vector<16x32xf32>,
    %c0_22 = arith.constant 0 : index
    %c0_23 = arith.constant 0 : index
    %29 = vector.load %arg10[%c0_22, %c0_23] : memref<16x32xf32, #tpu.memory_space<vmem>>, vector<16x32xf32>
    tpu.vector_store %arg10[%c0_22, %c0_23], %27 {strides = array<i32>} : memref<16x32xf32, #tpu.memory_space<vmem>>, vector<16x32xf32>,
    return
  }
  func.func @transform_0(%arg0: i32) -> (i32, i32) {
    %c0_i32 = arith.constant 0 : i32
    %c0_i32_0 = arith.constant 0 : i32
    return %arg0, %c0_i32 : i32, i32
  }
  func.func @transform_1(%arg0: i32) -> (i32, i32) {
    %c0_i32 = arith.constant 0 : i32
    %c0_i32_0 = arith.constant 0 : i32
    return %arg0, %c0_i32 : i32, i32
  }
  func.func @transform_2(%arg0: i32) -> (i32, i32) {
    %c0_i32 = arith.constant 0 : i32
    %c0_i32_0 = arith.constant 0 : i32
    %c0_i32_1 = arith.constant 0 : i32
    return %c0_i32, %c0_i32_0 : i32, i32
  }
  func.func @transform_3(%arg0: i32) -> (i32, i32) {
    %c0_i32 = arith.constant 0 : i32
    %c0_i32_0 = arith.constant 0 : i32
    %c0_i32_1 = arith.constant 0 : i32
    return %c0_i32, %c0_i32_0 : i32, i32
  }
  func.func @transform_4(%arg0: i32) -> (i32, i32) {
    %c0_i32 = arith.constant 0 : i32
    %c0_i32_0 = arith.constant 0 : i32
    %c0_i32_1 = arith.constant 0 : i32
    return %c0_i32, %c0_i32_0 : i32, i32
  }
  func.func @transform_5(%arg0: i32) -> (i32, i32) {
    %c0_i32 = arith.constant 0 : i32
    %c0_i32_0 = arith.constant 0 : i32
    %c0_i32_1 = arith.constant 0 : i32
    return %c0_i32, %c0_i32_0 : i32, i32
  }
  func.func @transform_6(%arg0: i32) -> (i32, i32) {
    %c0_i32 = arith.constant 0 : i32
    %c0_i32_0 = arith.constant 0 : i32
    %c0_i32_1 = arith.constant 0 : i32
    return %c0_i32, %c0_i32_0 : i32, i32
  }
  func.func @transform_7(%arg0: i32) -> (i32, i32) {
    %c0_i32 = arith.constant 0 : i32
    %c0_i32_0 = arith.constant 0 : i32
    %c0_i32_1 = arith.constant 0 : i32
    return %c0_i32, %c0_i32_0 : i32, i32
  }
  func.func @transform_8(%arg0: i32) -> (i32, i32) {
    %c0_i32 = arith.constant 0 : i32
    %c0_i32_0 = arith.constant 0 : i32
    return %arg0, %c0_i32 : i32, i32
  }
  func.func @transform_9(%arg0: i32) -> (i32, i32) {
    %c0_i32 = arith.constant 0 : i32
    %c0_i32_0 = arith.constant 0 : i32
    return %arg0, %c0_i32 : i32, i32
  }
}

</mosaic_0001>

<bundles_post_ra>
// kernel: tpu_custom_call.1
= control target key start
LH: loop header
LB: loop body
LE: loop exit
PB: predicated region body
PF: predicated region fallthrough
CT: control target
= control target key end

     0   :  { %s1765_s0 = inlined_call_operand.vmem [shape: f32[64,16], index: 0, kind: input, shape index: {}]   ;;  %s1766_s1 = inlined_call_operand.vmem [shape: f32[64,16], index: 1, kind: input, shape index: {}]   ;;  %s1767_s2 = inlined_call_operand.vmem [shape: f32[16,16], index: 2, kind: input, shape index: {}]   ;;  %s1768_s3 = inlined_call_operand.vmem [shape: f32[16,16], index: 3, kind: input, shape index: {}]   ;;  %s1769_s4 = inlined_call_operand.vmem [shape: f32[16,16], index: 4, kind: input, shape index: {}]   ;;  %s1770_s5 = inlined_call_operand.vmem [shape: f32[32,32], index: 5, kind: input, shape index: {}]   ;;  %s1771_s6 = inlined_call_operand.vmem [shape: f32[32,32], index: 6, kind: input, shape index: {}]   ;;  %s1772_s7 = inlined_call_operand.vmem [shape: f32[32,32], index: 7, kind: input, shape index: {}]   ;;  %s1773_s8 = inlined_call_operand.hbm [shape: f32[32,32], index: 8, kind: output, shape index: {0}]   ;;  %s1774_s9 = inlined_call_operand.hbm [shape: f32[32,32], index: 9, kind: output, shape index: {1}]  }
   0x1   :  { %1776 = sst [smem:[#allocation8_spill]] %s1765_s0 }
   0x2   :  { %1777 = sst [smem:[#allocation9_spill]] %s1766_s1 }
   0x3   :  { %15 = vsyncpa [#allocation3], 0 }
   0x4   :  { %17 = vsyncpa [#allocation3 + $0x1], 0 }
   0x5   :  { %18 = vsyncpa [#allocation5], 0 }
   0x6   :  { %20 = vsyncpa [#allocation5 + $0x1], 0  ;;  %s1533_s30 = smov 0   ;;  %s1535_s10 = smov 0  }
   0x7   :  { %s1537_s11 = smov 0   ;;  %s1539_s12 = smov 0  }
   0x8 LB: > { %s1554_s13 = sadd.s32 4294967295, %s1477_s12   ;;  %s1163_s14 = sadd.s32 4294967294, %s1477_s12   ;;  %s1477_s12 = sphi %s1539_s12, %s1788_s12   ;;  %s1473_s11 = sphi %s1537_s11, %s1787_s11   ;;  %s1469_s10 = sphi %s1535_s10, %s1786_s10   ;;  %s1465_s30 = sphi %s1533_s30, %s1785_s30  }
   0x9   : > { %s1558_s15 = sadd.s32 1, %s1477_s12   ;;  %s211_s16 = sadd.s32 1, %s1473_s11 }
   0xa   : > { %s208_s17 = ssub.s32 %s1477_s12, %s1558_s15  ;;  %p221_p0 = scmp.ne.s32.totalorder %s1473_s11, %s1469_s10 }
   0xb   : > { %p209_p1 = scmp.eq.s32.totalorder %s208_s17, 0  ;;  %p222_p2 = scmp.eq.s32.totalorder %s1554_s13, 1 }
   0xc   : > { %p227_p3 = scmp.ne.s32.totalorder %s1469_s10, %s1465_s30  ;;  %p228_p4 = scmp.eq.s32.totalorder %s1163_s14, 1 }
   0xd   : > { %s1569_s18 = scalar_select %p209_p1, %s1473_s11, %s211_s16  }
   0xe   : > { %p1571_p5 = por %p222_p2, %p221_p0  ;;  %p1575_p6 = por %p228_p4, %p227_p3 }
   0xf   : > { %p1166_p7 = scmp.ge.s32.totalorder %s1477_s12, 1  ;;  %p308_p8 = scmp.lt.s32.totalorder %s1477_s12, 3 }
  0x11   : > { %p309_p9 = pnand %p1166_p7, %p308_p8 }
  0x12   : > { %v376_v0 = vld [vmem:[%s1767_s2] sm:$0xff] (!%p309_p9)  ;;  %v377_v1 = vld [vmem:[%s1767_s2 + $0x8] sm:$0xff] (!%p309_p9)  ;;  %s1169_s27 = sshll.u32 (!%p309_p9), %s1554_s13, 2  ;;  %vm378_vm0 = vcmask (!%p309_p9), 130048   ;;  %s1780_s0 = sld [smem:[#allocation8_spill]] (!%p309_p9)  ;;  %v692_v32 = vld [vmem:[%s1770_s5 + $0x10] sm:$0xff] (!%p309_p9) }
  0x13   : > { %312 = sbr.rel (%p309_p9) target bundleno = 645 (0x285), region = 52  ;;  %v476_v2 = vld [vmem:[%s1768_s3] sm:$0xff] (!%p309_p9)  ;;  %v1300_v3 = vpack.c.bf16 (!%p309_p9), %v377_v1, %v376_v0  ;;  %v477_v4 = vld [vmem:[%s1768_s3 + $0x8] sm:$0xff] (!%p309_p9)  ;;  %p355_p10 = scmp.lt.s32.totalorder (!%p309_p9), %s1169_s27, 7  ;;  %v693_v33 = vld [vmem:[%s1770_s5 + $0x18] sm:$0xff] (!%p309_p9)  ;;  %vm766_vm1 = vcmask (!%p309_p9), 261120  }
  0x14   : > { %v579_v5 = vld [vmem:[%s1769_s4] sm:$0xff] (!%p309_p9)  ;;  %v580_v6 = vld [vmem:[%s1769_s4 + $0x8] sm:$0xff] (!%p309_p9)  ;;  %v1304_v7 = vpack.c.bf16 (!%p309_p9), %v477_v4, %v476_v2  ;;  %s1781_s1 = sld [smem:[#allocation9_spill]] (!%p309_p9)  ;;  %v1316_v37 = vpack.c.bf16 (!%p309_p9), %v693_v33, %v692_v32  ;;  %v696_v52 = vld [vmem:[%s1771_s6 + $0x10] sm:$0xff] (!%p309_p9)  ;;  %s1775_s21 = sshll.u32 (!%p309_p9), %s1554_s13, 8 }
  0x15   : > { %v1308_v8 = vpack.c.bf16 (!%p309_p9), %v580_v6, %v579_v5  ;;  %1301 = vmatprep.subr.bf16.mxu0 (!%p309_p9), %v1300_v3  ;;  %v690_v21 = vld [vmem:[%s1770_s5] sm:$0xff] (!%p309_p9)  ;;  %v691_v22 = vld [vmem:[%s1770_s5 + $0x8] sm:$0xff] (!%p309_p9)  ;;  %v697_v53 = vld [vmem:[%s1771_s6 + $0x18] sm:$0xff] (!%p309_p9)  ;;  %s1672_s24 = scalar_lea.hbm (!%p309_p9), %s1773_s8, %s1775_s21 }
  0x16   : > { %1303 = vmatpush3.bf16.msra.mxu0 (!%p309_p9), %v1300_v3  ;;  %1305 = vmatprep.subr.bf16.mxu1 (!%p309_p9), %v1304_v7  ;;  %v1312_v23 = vpack.c.bf16 (!%p309_p9), %v691_v22, %v690_v21  ;;  %v694_v38 = vld [vmem:[%s1771_s6] sm:$0xff] (!%p309_p9)  ;;  %v695_v39 = vld [vmem:[%s1771_s6 + $0x8] sm:$0xff] (!%p309_p9)  ;;  %v1324_v56 = vpack.c.bf16 (!%p309_p9), %v697_v53, %v696_v52  ;;  %v700_v61 = vld [vmem:[%s1772_s7 + $0x10] sm:$0xff] (!%p309_p9) }
  0x17   : > { %1307 = vmatpush3.bf16.msra.mxu1 (!%p309_p9), %v1304_v7  ;;  %1309 = vmatprep.subr.bf16.mxu0 (!%p309_p9), %v1308_v8  ;;  %v1320_v41 = vpack.c.bf16 (!%p309_p9), %v695_v39, %v694_v38  ;;  %v698_v45 = vld [vmem:[%s1772_s7] sm:$0xff] (!%p309_p9)  ;;  %v699_v46 = vld [vmem:[%s1772_s7 + $0x8] sm:$0xff] (!%p309_p9)  ;;  %v701_v62 = vld [vmem:[%s1772_s7 + $0x18] sm:$0xff] (!%p309_p9) }
  0x18   : > { %1313 = vmatprep.subr.bf16.mxu1 (!%p309_p9), %v1312_v23  ;;  %v1328_v48 = vpack.c.bf16 (!%p309_p9), %v699_v46, %v698_v45  ;;  %v1332_v63 = vpack.c.bf16 (!%p309_p9), %v701_v62, %v700_v61 }
  0x1a   : > { %s1790_s27 = smov (!%p355_p10, %s1169_s27), 7 }
  0x1b   : > { %s1170_s22 = sshll.u32 %s1790_s27, 3  ;;  %s1661_s27 = sand.u32 1, %s1469_s10  }
  0x1c   : > { %s358_s25 = scalar_lea.vmem %s1780_s0, %s1170_s22  ;;  %s364_s29 = scalar_lea.vmem %s1781_s1, %s1170_s22 }
  0x1d   : > { %v368_v9 = vld [vmem:[%s358_s25] sm:$0xff]  ;;  %v369_v11 = vld [vmem:[%s358_s25 + $0x8] sm:$0xff]  ;;  %v370_v13 = vld [vmem:[%s358_s25 + $0x10] sm:$0xff]  ;;  %s1167_s14 = sshll.u32 %s1661_s27, 4  ;;  %s1479_s22 = smov [#allocation2]  }
  0x1e   : > { %v372_v10 = vld [vmem:[%s364_s29] sm:$0xff]  ;;  %1241 = vmatprep.mubr.msk.f32.mxu0 %vm378_vm0, %v368_v9  ;;  %v373_v12 = vld [vmem:[%s364_s29 + $0x8] sm:$0xff]  ;;  %v374_v14 = vld [vmem:[%s364_s29 + $0x10] sm:$0xff]  ;;  %s346_s16 = scalar_lea.vmem [#allocation2], %s1167_s14  ;;  %s1387_s23 = sshll.u32 %s1479_s22, 4  ;;  %s1388_s23 = int_to_ptr.vmem [resolvable:$false] %s1387_s23 }
  0x1f   : > { %1251 = vmatprep.mubr.msk.f32.mxu1 %vm378_vm0, %v372_v10  ;;  %1242 = vmatmul.mubr.msk.f32.vlgmr.msra.gmra.mrb[0].mxu0 %vm378_vm0, %v369_v11  ;;  %v575_v15 = vadd.f32 %v372_v10, %v368_v9  ;;  %v371_v16 = vld [vmem:[%s358_s25 + $0x18] sm:$0xff]  ;;  %v576_v18 = vadd.f32 %v373_v12, %v369_v11  ;;  %v577_v19 = vadd.f32 %v374_v14, %v370_v13  ;;  %s1041_s17 = sshll.u32 %s346_s16, 4  ;;  %s1675_s25 = scalar_lea.vmem [#allocation4], %s1167_s14  ;;  %s1665_s17 = int_to_ptr.vmem [resolvable:$true] %s1041_s17 }
  0x20   : > { %1252 = vmatmul.mubr.msk.f32.vlgmr.msra.gmra.mrb[0].mxu1 %vm378_vm0, %v373_v12  ;;  %1311 = vmatpush3.bf16.msra.mxu0 %v1308_v8  ;;  %v375_v17 = vld [vmem:[%s364_s29 + $0x18] sm:$0xff]  ;;  %s1383_s29 = scalar_lea.vmem %s1665_s17, 256  ;;  %s1389_s21 = scalar_lea.vmem %s1388_s23, 512 }
  0x21   : > { %1244 = vmatprep.mubr.msk.f32.mxu0 %vm378_vm0, %v370_v13  ;;  %1254 = vmatprep.mubr.msk.f32.mxu1 %vm378_vm0, %v374_v14  ;;  %v578_v20 = vadd.f32 %v375_v17, %v371_v16  ;;  %p1384_p11 = scmp.ne.s32.totalorder %s1665_s17, %s1383_s29  ;;  %p1390_p0 = scmp.lt.s32.totalorder %s1665_s17, %s1388_s23 }
  0x22   : > { %1315 = vmatpush3.bf16.msra.mxu1 %v1312_v23  ;;  %1321 = vmatprep.subr.bf16.mxu0 %v1320_v41  ;;  %p1391_p1 = scmp.lt.s32.totalorder %s1389_s21, %s1383_s29 }
  0x23   : > { %1245 = vmatmul.mubr.msk.f32.gmra.mrb[2].mxu0 %vm378_vm0, %v371_v16  ;;  %1317 = vmatprep.subr.bf16.mxu1 %v1316_v37  ;;  %p1385_p12 = pnand %p1384_p11, %p1571_p5 }
  0x24   : > { %1255 = vmatmul.mubr.msk.f32.gmra.mrb[2].mxu1 %vm378_vm0, %v375_v17  ;;  %1261 = vmatprep.mubr.msk.f32.mxu0 %vm378_vm0, %v575_v15  ;;  %p1392_p2 = por %p1391_p1, %p1390_p0 }
  0x25   : > { %p1386_p13 = pneg %p1385_p12 }
  0x26   : > { %1319 = vmatpush3.bf16.msra.mxu1 %v1316_v37 }
  0x27   : > { %1262 = vmatmul.mubr.msk.f32.vlgmr.msra.gmra.mrb[4].mxu0 %vm378_vm0, %v576_v18  ;;  %1329 = vmatprep.subr.bf16.mxu1 %v1328_v48  ;;  %p1393_p3 = pnand %p1392_p2, %p1386_p13 }
  0x28   : > { %1264 = vmatprep.mubr.msk.f32.mxu0 %vm378_vm0, %v577_v19  ;;  %1323 = vmatpush3.bf16.msra.mxu0 %v1320_v41 }
  0x29   : > { %1325 = vmatprep.subr.bf16.mxu0 %v1324_v56 }
  0x2b   : > { %1265 = vmatmul.mubr.msk.f32.gmra.mrb[6].mxu0 %vm378_vm0, %v578_v20 }
  0x2c   : > { %1327 = vmatpush3.bf16.msra.mxu0 %v1324_v56 }
  0xf2   : > { %v1243_v24 = vpop.f32.mrb[0].mxu0 }
  0xf3   : > { %v1253_v25 = vpop.f32.mrb[0].mxu1  ;;  %v457_v26 = vpop.f32.mrb[1].mxu0 }
  0xf4   : > { %v556_v27 = vpop.f32.mrb[1].mxu1  ;;  %v679_v28 = vsub.f32 %v1243_v24, %v1253_v25 }
  0xf5   : > { %v678_v29 = vsub.f32 %v457_v26, %v556_v27 }
  0xf6   : > { %v1246_v31 = vpop.f32.mrb[2].mxu0 }
  0xf7   : > { %v1256_v30 = vpop.f32.mrb[2].mxu1  ;;  %702 = vxpose.xlu0.b32.start [1/4] (short) (narrow) %v678_v29, 16  ;;  %v467_v34 = vpop.f32.mrb[3].mxu0 }
  0xf8   : > { %v566_v35 = vpop.f32.mrb[3].mxu1  ;;  %v681_v36 = vsub.f32 %v1246_v31, %v1256_v30 }
  0xf9   : > { %v680_v40 = vsub.f32 %v467_v34, %v566_v35 }
  0xfa   : > { %v1263_v42 = vpop.f32.mrb[4].mxu0 }
  0xfb   : > { %703 = vxpose.xlu0.b32.cont [2/4] (short) (narrow) %v679_v28, 16  ;;  %v683_v43 = vsub.f32 %v1263_v42, %v1243_v24  ;;  %v659_v44 = vpop.f32.mrb[5].mxu0 }
  0xfc   : > { %v682_v47 = vsub.f32 %v659_v44, %v457_v26 }
  0xfd   : > { %v687_v49 = vsub.f32 %v683_v43, %v1253_v25 }
  0xfe   : > { %v1266_v50 = vpop.f32.mrb[6].mxu0  ;;  %v686_v51 = vsub.f32 %v682_v47, %v556_v27 }
  0xff   : > { %704 = vxpose.xlu0.b32.cont [3/4] (short) (narrow) %v680_v40, 16  ;;  %v685_v54 = vsub.f32 %v1266_v50, %v1246_v31  ;;  %v669_v55 = vpop.f32.mrb[7].mxu0 }
 0x100   : > { %v684_v57 = vsub.f32 %v669_v55, %v467_v34  ;;  %734 = vxpose.xlu1.b32.start [1/4] (short) (narrow) %v686_v51, 16 }
 0x101   : > { %v689_v58 = vsub.f32 %v685_v54, %v1256_v30 }
 0x102   : > { %v688_v59 = vsub.f32 %v684_v57, %v566_v35 }
 0x103   : > { %705 = vxpose.xlu0.b32.end [4/4] (short) (narrow) %v681_v36, 16 }
 0x104   : > { %735 = vxpose.xlu1.b32.cont [2/4] (short) (narrow) %v687_v49, 16 }
 0x108   : > { %736 = vxpose.xlu1.b32.cont [3/4] (short) (narrow) %v688_v59, 16 }
 0x10c   : > { %737 = vxpose.xlu1.b32.end [4/4] (short) (narrow) %v689_v58, 16 }
 0x177   : > { %v718_v60 = vpop.trf.xlu0 }
 0x178   : > { %1275 = vmatprep.mubr.msk.f32.mxu1 %vm766_vm1, %v718_v60 }
 0x17b   : > { %v719_v0 = vpop.trf.xlu0 }
 0x17c   : > { %1276 = vmatmul.mubr.msk.f32.vlgmr.msra.gmra.mrb[4].mxu1 %vm766_vm1, %v719_v0 }
 0x17d   : > { %1331 = vmatpush3.bf16.msra.mxu1 %v1328_v48 }
 0x17e   : > { %1333 = vmatprep.subr.bf16.mxu1 %v1332_v63 }
 0x180   : > { %v750_v1 = vpop.trf.xlu1 }
 0x181   : > { %1335 = vmatpush3.bf16.msra.mxu1 %v1332_v63  ;;  %v929_v2 = vadd.f32 %v750_v1, %v718_v60  ;;  %1286 = vmatprep.mubr.msk.f32.mxu0 %vm766_vm1, %v750_v1 }
 0x183   : > { %1297 = vmatprep.mubr.msk.f32.mxu1 %vm766_vm1, %v929_v2 }
 0x184   : > { %v751_v3 = vpop.trf.xlu1 }
 0x185   : > { %v930_v4 = vadd.f32 %v751_v3, %v719_v0  ;;  %1287 = vmatmul.mubr.msk.f32.vlgmr.msra.gmra.mrb[8].mxu0 %vm766_vm1, %v751_v3 }
 0x187   : > { %1298 = vmatmul.mubr.msk.f32.vlgmr.msra.gmra.mrb[6].mxu1 %vm766_vm1, %v930_v4 }
 0x24f   : > { %v1277_v5 = vpop.f32.mrb[4].mxu1 }
 0x250   : > { %v839_v6 = vpop.f32.mrb[5].mxu1 }
 0x258   : > { %v1288_v7 = vpop.f32.mrb[8].mxu0 }
 0x259   : > { %v1013_v8 = vsub.f32 %v1277_v5, %v1288_v7  ;;  %v920_v9 = vpop.f32.mrb[9].mxu0 }
 0x25a   : > { %v1012_v10 = vsub.f32 %v839_v6, %v920_v9  ;;  %v1299_v11 = vpop.f32.mrb[6].mxu1 }
 0x25b   : > { %1019 = vst.msk [vmem:[%s346_s16 + $0x8] sm:$0xff] %vm766_vm1, %v1013_v8  ;;  %v1015_v12 = vsub.f32 %v1299_v11, %v1277_v5  ;;  %v1003_v13 = vpop.f32.mrb[7].mxu1 }
 0x25c   : > { %1018 = vst.msk [vmem:[%s346_s16] sm:$0xff] %vm766_vm1, %v1012_v10  ;;  %v1014_v14 = vsub.f32 %v1003_v13, %v839_v6 }
 0x25d   : > { %v1017_v15 = vsub.f32 %v1015_v12, %v1288_v7 }
 0x25e   : > { %1396 = shalt.err (!%p1393_p3)
}
 0x25f   : > { %s1397_s14 = scalar_lea.hbm %s1672_s24, 256  ;;  %s1401_s22 = scalar_lea.hbm %s1773_s8, 512 }
 0x260   : > { %p1398_p4 = scmp.ne.s32.totalorder %s1672_s24, %s1397_s14  ;;  %p1402_p9 = scmp.lt.u32.totalorder %s1672_s24, %s1773_s8 }
 0x261   : > { %p1403_p10 = scmp.lt.u32.totalorder %s1401_s22, %s1397_s14  ;;  %p1405_p12 = scmp.lt.u32.totalorder %s1397_s14, %s1672_s24 }
 0x262   : > { %p1399_p7 = pnand %p1398_p4, %p1571_p5 }
 0x263   : > { %p1404_p11 = por %p1403_p10, %p1402_p9 }
 0x264   : > { %p1400_p8 = pneg %p1399_p7 }
 0x265   : > { %p1406_p13 = por %p1405_p12, %p1404_p11 }
 0x267   : > { %p1407_p0 = pnand %p1406_p13, %p1400_p8 }
 0x269   : > { %1410 = shalt.err (!%p1407_p0)
}
 0x26a   : > { %s1480_s21 = smov 128   ;;  %s1481_s26 = smov 8   ;;  %v1016_v16 = vsub.f32 %v1014_v14, %v920_v9  ;;  %1021 = vst.msk [vmem:[%s1675_s25 + $0x8] sm:$0xff] %vm766_vm1, %v1017_v15 }
 0x26b   : > { %s1782_s28 = scalar_lea.sflag [#allocation3], %s1661_s27  ;;  %s1783_s29 = sshll.u32 %s1554_s13, 8 }
 0x26c   : > { %1336 = dma.vmem_to_hbm [thread:$0]  (%p1571_p5), %s1665_s17, 256, %s1672_s24, %s1782_s28, %s1480_s21, %s1480_s21, %s1481_s26  }
 0x26d   : > { %s1711_s22 = scalar_lea.hbm %s1774_s9, %s1783_s29  ;;  %s1784_s23 = sshll.u32 %s1675_s25, 4  ;;  %1020 = vst.msk [vmem:[%s1675_s25] sm:$0xff] %vm766_vm1, %v1016_v16  ;;  %s1715_s23 = int_to_ptr.vmem [resolvable:$true] %s1784_s23 }
 0x26e   : > { %s1028_s0 = scalar_lea.sflag [#allocation5], %s1661_s27  ;;  %s1411_s1 = scalar_lea.vmem %s1715_s23, 256 }
 0x26f   : > { %p1412_p1 = scmp.ne.s32.totalorder %s1715_s23, %s1411_s1  ;;  %s1482_s13 = smov [#allocation4]  }
 0x270   : > { %s1415_s17 = sshll.u32 %s1482_s13, 4  ;;  %s1416_s17 = int_to_ptr.vmem [resolvable:$false] %s1415_s17 }
 0x271   : > { %p1413_p2 = pnand %p1412_p1, %p1571_p5  ;;  %s1417_s24 = scalar_lea.vmem %s1416_s17, 512 }
 0x272   : > { %p1418_p4 = scmp.lt.s32.totalorder %s1715_s23, %s1416_s17  ;;  %p1419_p7 = scmp.lt.s32.totalorder %s1417_s24, %s1411_s1 }
 0x273   : > { %p1414_p3 = pneg %p1413_p2 }
 0x274   : > { %p1420_p8 = por %p1419_p7, %p1418_p4 }
 0x276   : > { %p1421_p9 = pnand %p1420_p8, %p1414_p3 }
 0x278   : > { %1424 = shalt.err (!%p1421_p9)
}
 0x279   : > { %s1425_s25 = scalar_lea.hbm %s1711_s22, 256  ;;  %s1429_s14 = scalar_lea.hbm %s1774_s9, 512 }
 0x27a   : > { %p1426_p10 = scmp.ne.s32.totalorder %s1711_s22, %s1425_s25  ;;  %p1430_p13 = scmp.lt.u32.totalorder %s1711_s22, %s1774_s9 }
 0x27b   : > { %p1431_p0 = scmp.lt.u32.totalorder %s1429_s14, %s1425_s25  ;;  %p1433_p2 = scmp.lt.u32.totalorder %s1425_s25, %s1711_s22 }
 0x27c   : > { %p1427_p11 = pnand %p1426_p10, %p1571_p5 }
 0x27d   : > { %p1432_p1 = por %p1431_p0, %p1430_p13 }
 0x27e   : > { %p1428_p12 = pneg %p1427_p11 }
 0x27f   : > { %p1434_p3 = por %p1433_p2, %p1432_p1 }
 0x281   : > { %p1435_p4 = pnand %p1434_p3, %p1428_p12 }
 0x283   : > { %1438 = shalt.err (!%p1435_p4)
}
 0x284   : > { %1337 = dma.vmem_to_hbm [thread:$0]  (%p1571_p5), %s1715_s23, 256, %s1711_s22, %s1028_s0, %s1480_s21, %s1480_s21, %s1481_s26  }
 0x285 PF: > { %p1347_p7 = scmp.ge.s32.totalorder %s1477_s12, 2  ;;  %s1072_s1 = sand.u32 1, %s1465_s30  }
 0x286   : > { %s1073_s17 = scalar_lea.sflag [#allocation3], %s1072_s1 }
 0x287   : > { %p1341_p8 = pnand %p1347_p7, %p1575_p6 }
 0x289   : > { %1456 = dma.done.wait (!%p1341_p8), %s1073_s17, 256  }
 0x28a   : > { %1458 = vsyncadd (!%p1341_p8), %s1073_s17, 4294967040  ;;  %s1082_s19 = scalar_lea.sflag [#allocation5], %s1072_s1 }
 0x28b   : > { %1460 = dma.done.wait (!%p1341_p8), %s1082_s19, 256  }
 0x28c   : > { %1462 = vsyncadd (!%p1341_p8), %s1082_s19, 4294967040  ;;  %p23_p5 = scmp.ge.s32.totalorder %s1558_s15, 4   ;;  %s1785_s30 = smov %s1469_s10 }
 0x28d   : > { %s1786_s10 = smov %s1473_s11  ;;  %s1787_s11 = smov %s1569_s18 }
 0x28e   : > { %s1788_s12 = smov %s1558_s15  ;;  %25 = sbr.rel (!%p23_p5) target bundleno = 8 (0x8), region = 107 }
 0x295   :  { %1087 = vsyncpa [#allocation3], 1 }
 0x296   :  { %1089 = vsyncpa [#allocation3 + $0x1], 1 }
 0x297   :  { %1090 = vsyncpa [#allocation5], 1 }
 0x298   :  { %1092 = vsyncpa [#allocation5 + $0x1], 1 }

// kernel: tpu_custom_call.1
= control target key start
LH: loop header
LB: loop body
LE: loop exit
PB: predicated region body
PF: predicated region fallthrough
CT: control target
= control target key end

     0   :  { %s1765_s0 = inlined_call_operand.vmem [shape: f32[64,16], index: 0, kind: input, shape index: {}]   ;;  %s1766_s1 = inlined_call_operand.vmem [shape: f32[64,16], index: 1, kind: input, shape index: {}]   ;;  %s1767_s2 = inlined_call_operand.vmem [shape: f32[16,16], index: 2, kind: input, shape index: {}]   ;;  %s1768_s3 = inlined_call_operand.vmem [shape: f32[16,16], index: 3, kind: input, shape index: {}]   ;;  %s1769_s4 = inlined_call_operand.vmem [shape: f32[16,16], index: 4, kind: input, shape index: {}]   ;;  %s1770_s5 = inlined_call_operand.vmem [shape: f32[32,32], index: 5, kind: input, shape index: {}]   ;;  %s1771_s6 = inlined_call_operand.vmem [shape: f32[32,32], index: 6, kind: input, shape index: {}]   ;;  %s1772_s7 = inlined_call_operand.vmem [shape: f32[32,32], index: 7, kind: input, shape index: {}]   ;;  %s1773_s8 = inlined_call_operand.hbm [shape: f32[32,32], index: 8, kind: output, shape index: {0}]   ;;  %s1774_s9 = inlined_call_operand.hbm [shape: f32[32,32], index: 9, kind: output, shape index: {1}]  }
   0x1   :  { %1776 = sst [smem:[#allocation8_spill]] %s1765_s0 }
   0x2   :  { %1777 = sst [smem:[#allocation9_spill]] %s1766_s1 }
   0x3   :  { %15 = vsyncpa [#allocation3], 0 }
   0x4   :  { %17 = vsyncpa [#allocation3 + $0x1], 0 }
   0x5   :  { %18 = vsyncpa [#allocation5], 0 }
   0x6   :  { %20 = vsyncpa [#allocation5 + $0x1], 0  ;;  %s1533_s30 = smov 0   ;;  %s1535_s10 = smov 0  }
   0x7   :  { %s1537_s11 = smov 0   ;;  %s1539_s12 = smov 0  }
   0x8 LB: > { %s1554_s13 = sadd.s32 4294967295, %s1477_s12   ;;  %s1163_s14 = sadd.s32 4294967294, %s1477_s12   ;;  %s1477_s12 = sphi %s1539_s12, %s1788_s12   ;;  %s1473_s11 = sphi %s1537_s11, %s1787_s11   ;;  %s1469_s10 = sphi %s1535_s10, %s1786_s10   ;;  %s1465_s30 = sphi %s1533_s30, %s1785_s30  }
   0x9   : > { %s1558_s15 = sadd.s32 1, %s1477_s12   ;;  %s211_s16 = sadd.s32 1, %s1473_s11 }
   0xa   : > { %s208_s17 = ssub.s32 %s1477_s12, %s1558_s15  ;;  %p221_p0 = scmp.ne.s32.totalorder %s1473_s11, %s1469_s10 }
   0xb   : > { %p209_p1 = scmp.eq.s32.totalorder %s208_s17, 0  ;;  %p222_p2 = scmp.eq.s32.totalorder %s1554_s13, 1 }
   0xc   : > { %p227_p3 = scmp.ne.s32.totalorder %s1469_s10, %s1465_s30  ;;  %p228_p4 = scmp.eq.s32.totalorder %s1163_s14, 1 }
   0xd   : > { %s1569_s18 = scalar_select %p209_p1, %s1473_s11, %s211_s16  }
   0xe   : > { %p1571_p5 = por %p222_p2, %p221_p0  ;;  %p1575_p6 = por %p228_p4, %p227_p3 }
   0xf   : > { %p1166_p7 = scmp.ge.s32.totalorder %s1477_s12, 1  ;;  %p308_p8 = scmp.lt.s32.totalorder %s1477_s12, 3 }
  0x11   : > { %p309_p9 = pnand %p1166_p7, %p308_p8 }
  0x12   : > { %v376_v0 = vld [vmem:[%s1767_s2] sm:$0xff] (!%p309_p9)  ;;  %v377_v1 = vld [vmem:[%s1767_s2 + $0x8] sm:$0xff] (!%p309_p9)  ;;  %s1169_s27 = sshll.u32 (!%p309_p9), %s1554_s13, 2  ;;  %vm378_vm0 = vcmask (!%p309_p9), 130048   ;;  %s1780_s0 = sld [smem:[#allocation8_spill]] (!%p309_p9)  ;;  %v692_v32 = vld [vmem:[%s1770_s5 + $0x10] sm:$0xff] (!%p309_p9) }
  0x13   : > { %312 = sbr.rel (%p309_p9) target bundleno = 645 (0x285), region = 52  ;;  %v476_v2 = vld [vmem:[%s1768_s3] sm:$0xff] (!%p309_p9)  ;;  %v1300_v3 = vpack.c.bf16 (!%p309_p9), %v377_v1, %v376_v0  ;;  %v477_v4 = vld [vmem:[%s1768_s3 + $0x8] sm:$0xff] (!%p309_p9)  ;;  %p355_p10 = scmp.lt.s32.totalorder (!%p309_p9), %s1169_s27, 7  ;;  %v693_v33 = vld [vmem:[%s1770_s5 + $0x18] sm:$0xff] (!%p309_p9)  ;;  %vm766_vm1 = vcmask (!%p309_p9), 261120  }
  0x14   : > { %v579_v5 = vld [vmem:[%s1769_s4] sm:$0xff] (!%p309_p9)  ;;  %v580_v6 = vld [vmem:[%s1769_s4 + $0x8] sm:$0xff] (!%p309_p9)  ;;  %v1304_v7 = vpack.c.bf16 (!%p309_p9), %v477_v4, %v476_v2  ;;  %s1781_s1 = sld [smem:[#allocation9_spill]] (!%p309_p9)  ;;  %v1316_v37 = vpack.c.bf16 (!%p309_p9), %v693_v33, %v692_v32  ;;  %v696_v52 = vld [vmem:[%s1771_s6 + $0x10] sm:$0xff] (!%p309_p9)  ;;  %s1775_s21 = sshll.u32 (!%p309_p9), %s1554_s13, 8 }
  0x15   : > { %v1308_v8 = vpack.c.bf16 (!%p309_p9), %v580_v6, %v579_v5  ;;  %1301 = vmatprep.subr.bf16.mxu0 (!%p309_p9), %v1300_v3  ;;  %v690_v21 = vld [vmem:[%s1770_s5] sm:$0xff] (!%p309_p9)  ;;  %v691_v22 = vld [vmem:[%s1770_s5 + $0x8] sm:$0xff] (!%p309_p9)  ;;  %v697_v53 = vld [vmem:[%s1771_s6 + $0x18] sm:$0xff] (!%p309_p9)  ;;  %s1672_s24 = scalar_lea.hbm (!%p309_p9), %s1773_s8, %s1775_s21 }
  0x16   : > { %1303 = vmatpush3.bf16.msra.mxu0 (!%p309_p9), %v1300_v3  ;;  %1305 = vmatprep.subr.bf16.mxu1 (!%p309_p9), %v1304_v7  ;;  %v1312_v23 = vpack.c.bf16 (!%p309_p9), %v691_v22, %v690_v21  ;;  %v694_v38 = vld [vmem:[%s1771_s6] sm:$0xff] (!%p309_p9)  ;;  %v695_v39 = vld [vmem:[%s1771_s6 + $0x8] sm:$0xff] (!%p309_p9)  ;;  %v1324_v56 = vpack.c.bf16 (!%p309_p9), %v697_v53, %v696_v52  ;;  %v700_v61 = vld [vmem:[%s1772_s7 + $0x10] sm:$0xff] (!%p309_p9) }
  0x17   : > { %1307 = vmatpush3.bf16.msra.mxu1 (!%p309_p9), %v1304_v7  ;;  %1309 = vmatprep.subr.bf16.mxu0 (!%p309_p9), %v1308_v8  ;;  %v1320_v41 = vpack.c.bf16 (!%p309_p9), %v695_v39, %v694_v38  ;;  %v698_v45 = vld [vmem:[%s1772_s7] sm:$0xff] (!%p309_p9)  ;;  %v699_v46 = vld [vmem:[%s1772_s7 + $0x8] sm:$0xff] (!%p309_p9)  ;;  %v701_v62 = vld [vmem:[%s1772_s7 + $0x18] sm:$0xff] (!%p309_p9) }
  0x18   : > { %1313 = vmatprep.subr.bf16.mxu1 (!%p309_p9), %v1312_v23  ;;  %v1328_v48 = vpack.c.bf16 (!%p309_p9), %v699_v46, %v698_v45  ;;  %v1332_v63 = vpack.c.bf16 (!%p309_p9), %v701_v62, %v700_v61 }
  0x1a   : > { %s1790_s27 = smov (!%p355_p10, %s1169_s27), 7 }
  0x1b   : > { %s1170_s22 = sshll.u32 %s1790_s27, 3  ;;  %s1661_s27 = sand.u32 1, %s1469_s10  }
  0x1c   : > { %s358_s25 = scalar_lea.vmem %s1780_s0, %s1170_s22  ;;  %s364_s29 = scalar_lea.vmem %s1781_s1, %s1170_s22 }
  0x1d   : > { %v368_v9 = vld [vmem:[%s358_s25] sm:$0xff]  ;;  %v369_v11 = vld [vmem:[%s358_s25 + $0x8] sm:$0xff]  ;;  %v370_v13 = vld [vmem:[%s358_s25 + $0x10] sm:$0xff]  ;;  %s1167_s14 = sshll.u32 %s1661_s27, 4  ;;  %s1479_s22 = smov [#allocation2]  }
  0x1e   : > { %v372_v10 = vld [vmem:[%s364_s29] sm:$0xff]  ;;  %1241 = vmatprep.mubr.msk.f32.mxu0 %vm378_vm0, %v368_v9  ;;  %v373_v12 = vld [vmem:[%s364_s29 + $0x8] sm:$0xff]  ;;  %v374_v14 = vld [vmem:[%s364_s29 + $0x10] sm:$0xff]  ;;  %s346_s16 = scalar_lea.vmem [#allocation2], %s1167_s14  ;;  %s1387_s23 = sshll.u32 %s1479_s22, 4  ;;  %s1388_s23 = int_to_ptr.vmem [resolvable:$false] %s1387_s23 }
  0x1f   : > { %1251 = vmatprep.mubr.msk.f32.mxu1 %vm378_vm0, %v372_v10  ;;  %1242 = vmatmul.mubr.msk.f32.vlgmr.msra.gmra.mrb[0].mxu0 %vm378_vm0, %v369_v11  ;;  %v575_v15 = vadd.f32 %v372_v10, %v368_v9  ;;  %v371_v16 = vld [vmem:[%s358_s25 + $0x18] sm:$0xff]  ;;  %v576_v18 = vadd.f32 %v373_v12, %v369_v11  ;;  %v577_v19 = vadd.f32 %v374_v14, %v370_v13  ;;  %s1041_s17 = sshll.u32 %s346_s16, 4  ;;  %s1675_s25 = scalar_lea.vmem [#allocation4], %s1167_s14  ;;  %s1665_s17 = int_to_ptr.vmem [resolvable:$true] %s1041_s17 }
  0x20   : > { %1252 = vmatmul.mubr.msk.f32.vlgmr.msra.gmra.mrb[0].mxu1 %vm378_vm0, %v373_v12  ;;  %1311 = vmatpush3.bf16.msra.mxu0 %v1308_v8  ;;  %v375_v17 = vld [vmem:[%s364_s29 + $0x18] sm:$0xff]  ;;  %s1383_s29 = scalar_lea.vmem %s1665_s17, 256  ;;  %s1389_s21 = scalar_lea.vmem %s1388_s23, 512 }
  0x21   : > { %1244 = vmatprep.mubr.msk.f32.mxu0 %vm378_vm0, %v370_v13  ;;  %1254 = vmatprep.mubr.msk.f32.mxu1 %vm378_vm0, %v374_v14  ;;  %v578_v20 = vadd.f32 %v375_v17, %v371_v16  ;;  %p1384_p11 = scmp.ne.s32.totalorder %s1665_s17, %s1383_s29  ;;  %p1390_p0 = scmp.lt.s32.totalorder %s1665_s17, %s1388_s23 }
  0x22   : > { %1315 = vmatpush3.bf16.msra.mxu1 %v1312_v23  ;;  %1321 = vmatprep.subr.bf16.mxu0 %v1320_v41  ;;  %p1391_p1 = scmp.lt.s32.totalorder %s1389_s21, %s1383_s29 }
  0x23   : > { %1245 = vmatmul.mubr.msk.f32.gmra.mrb[2].mxu0 %vm378_vm0, %v371_v16  ;;  %1317 = vmatprep.subr.bf16.mxu1 %v1316_v37  ;;  %p1385_p12 = pnand %p1384_p11, %p1571_p5 }
  0x24   : > { %1255 = vmatmul.mubr.msk.f32.gmra.mrb[2].mxu1 %vm378_vm0, %v375_v17  ;;  %1261 = vmatprep.mubr.msk.f32.mxu0 %vm378_vm0, %v575_v15  ;;  %p1392_p2 = por %p1391_p1, %p1390_p0 }
  0x25   : > { %p1386_p13 = pneg %p1385_p12 }
  0x26   : > { %1319 = vmatpush3.bf16.msra.mxu1 %v1316_v37 }
  0x27   : > { %1262 = vmatmul.mubr.msk.f32.vlgmr.msra.gmra.mrb[4].mxu0 %vm378_vm0, %v576_v18  ;;  %1329 = vmatprep.subr.bf16.mxu1 %v1328_v48  ;;  %p1393_p3 = pnand %p1392_p2, %p1386_p13 }
  0x28   : > { %1264 = vmatprep.mubr.msk.f32.mxu0 %vm378_vm0, %v577_v19  ;;  %1323 = vmatpush3.bf16.msra.mxu0 %v1320_v41 }
  0x29   : > { %1325 = vmatprep.subr.bf16.mxu0 %v1324_v56 }
  0x2b   : > { %1265 = vmatmul.mubr.msk.f32.gmra.mrb[6].mxu0 %vm378_vm0, %v578_v20 }
  0x2c   : > { %1327 = vmatpush3.bf16.msra.mxu0 %v1324_v56 }
  0xf2   : > { %v1243_v24 = vpop.f32.mrb[0].mxu0 }
  0xf3   : > { %v1253_v25 = vpop.f32.mrb[0].mxu1  ;;  %v457_v26 = vpop.f32.mrb[1].mxu0 }
  0xf4   : > { %v556_v27 = vpop.f32.mrb[1].mxu1  ;;  %v679_v28 = vsub.f32 %v1243_v24, %v1253_v25 }
  0xf5   : > { %v678_v29 = vsub.f32 %v457_v26, %v556_v27 }
  0xf6   : > { %v1246_v31 = vpop.f32.mrb[2].mxu0 }
  0xf7   : > { %v1256_v30 = vpop.f32.mrb[2].mxu1  ;;  %702 = vxpose.xlu0.b32.start [1/4] (short) (narrow) %v678_v29, 16  ;;  %v467_v34 = vpop.f32.mrb[3].mxu0 }
  0xf8   : > { %v566_v35 = vpop.f32.mrb[3].mxu1  ;;  %v681_v36 = vsub.f32 %v1246_v31, %v1256_v30 }
  0xf9   : > { %v680_v40 = vsub.f32 %v467_v34, %v566_v35 }
  0xfa   : > { %v1263_v42 = vpop.f32.mrb[4].mxu0 }
  0xfb   : > { %703 = vxpose.xlu0.b32.cont [2/4] (short) (narrow) %v679_v28, 16  ;;  %v683_v43 = vsub.f32 %v1263_v42, %v1243_v24  ;;  %v659_v44 = vpop.f32.mrb[5].mxu0 }
  0xfc   : > { %v682_v47 = vsub.f32 %v659_v44, %v457_v26 }
  0xfd   : > { %v687_v49 = vsub.f32 %v683_v43, %v1253_v25 }
  0xfe   : > { %v1266_v50 = vpop.f32.mrb[6].mxu0  ;;  %v686_v51 = vsub.f32 %v682_v47, %v556_v27 }
  0xff   : > { %704 = vxpose.xlu0.b32.cont [3/4] (short) (narrow) %v680_v40, 16  ;;  %v685_v54 = vsub.f32 %v1266_v50, %v1246_v31  ;;  %v669_v55 = vpop.f32.mrb[7].mxu0 }
 0x100   : > { %v684_v57 = vsub.f32 %v669_v55, %v467_v34  ;;  %734 = vxpose.xlu1.b32.start [1/4] (short) (narrow) %v686_v51, 16 }
 0x101   : > { %v689_v58 = vsub.f32 %v685_v54, %v1256_v30 }
 0x102   : > { %v688_v59 = vsub.f32 %v684_v57, %v566_v35 }
 0x103   : > { %705 = vxpose.xlu0.b32.end [4/4] (short) (narrow) %v681_v36, 16 }
 0x104   : > { %735 = vxpose.xlu1.b32.cont [2/4] (short) (narrow) %v687_v49, 16 }
 0x108   : > { %736 = vxpose.xlu1.b32.cont [3/4] (short) (narrow) %v688_v59, 16 }
 0x10c   : > { %737 = vxpose.xlu1.b32.end [4/4] (short) (narrow) %v689_v58, 16 }
 0x177   : > { %v718_v60 = vpop.trf.xlu0 }
 0x178   : > { %1275 = vmatprep.mubr.msk.f32.mxu1 %vm766_vm1, %v718_v60 }
 0x17b   : > { %v719_v0 = vpop.trf.xlu0 }
 0x17c   : > { %1276 = vmatmul.mubr.msk.f32.vlgmr.msra.gmra.mrb[4].mxu1 %vm766_vm1, %v719_v0 }
 0x17d   : > { %1331 = vmatpush3.bf16.msra.mxu1 %v1328_v48 }
 0x17e   : > { %1333 = vmatprep.subr.bf16.mxu1 %v1332_v63 }
 0x180   : > { %v750_v1 = vpop.trf.xlu1 }
 0x181   : > { %1335 = vmatpush3.bf16.msra.mxu1 %v1332_v63  ;;  %v929_v2 = vadd.f32 %v750_v1, %v718_v60  ;;  %1286 = vmatprep.mubr.msk.f32.mxu0 %vm766_vm1, %v750_v1 }
 0x183   : > { %1297 = vmatprep.mubr.msk.f32.mxu1 %vm766_vm1, %v929_v2 }
 0x184   : > { %v751_v3 = vpop.trf.xlu1 }
 0x185   : > { %v930_v4 = vadd.f32 %v751_v3, %v719_v0  ;;  %1287 = vmatmul.mubr.msk.f32.vlgmr.msra.gmra.mrb[8].mxu0 %vm766_vm1, %v751_v3 }
 0x187   : > { %1298 = vmatmul.mubr.msk.f32.vlgmr.msra.gmra.mrb[6].mxu1 %vm766_vm1, %v930_v4 }
 0x24f   : > { %v1277_v5 = vpop.f32.mrb[4].mxu1 }
 0x250   : > { %v839_v6 = vpop.f32.mrb[5].mxu1 }
 0x258   : > { %v1288_v7 = vpop.f32.mrb[8].mxu0 }
 0x259   : > { %v1013_v8 = vsub.f32 %v1277_v5, %v1288_v7  ;;  %v920_v9 = vpop.f32.mrb[9].mxu0 }
 0x25a   : > { %v1012_v10 = vsub.f32 %v839_v6, %v920_v9  ;;  %v1299_v11 = vpop.f32.mrb[6].mxu1 }
 0x25b   : > { %1019 = vst.msk [vmem:[%s346_s16 + $0x8] sm:$0xff] %vm766_vm1, %v1013_v8  ;;  %v1015_v12 = vsub.f32 %v1299_v11, %v1277_v5  ;;  %v1003_v13 = vpop.f32.mrb[7].mxu1 }
 0x25c   : > { %1018 = vst.msk [vmem:[%s346_s16] sm:$0xff] %vm766_vm1, %v1012_v10  ;;  %v1014_v14 = vsub.f32 %v1003_v13, %v839_v6 }
 0x25d   : > { %v1017_v15 = vsub.f32 %v1015_v12, %v1288_v7 }
 0x25e   : > { %1396 = shalt.err (!%p1393_p3)
}
 0x25f   : > { %s1397_s14 = scalar_lea.hbm %s1672_s24, 256  ;;  %s1401_s22 = scalar_lea.hbm %s1773_s8, 512 }
 0x260   : > { %p1398_p4 = scmp.ne.s32.totalorder %s1672_s24, %s1397_s14  ;;  %p1402_p9 = scmp.lt.u32.totalorder %s1672_s24, %s1773_s8 }
 0x261   : > { %p1403_p10 = scmp.lt.u32.totalorder %s1401_s22, %s1397_s14  ;;  %p1405_p12 = scmp.lt.u32.totalorder %s1397_s14, %s1672_s24 }
 0x262   : > { %p1399_p7 = pnand %p1398_p4, %p1571_p5 }
 0x263   : > { %p1404_p11 = por %p1403_p10, %p1402_p9 }
 0x264   : > { %p1400_p8 = pneg %p1399_p7 }
 0x265   : > { %p1406_p13 = por %p1405_p12, %p1404_p11 }
 0x267   : > { %p1407_p0 = pnand %p1406_p13, %p1400_p8 }
 0x269   : > { %1410 = shalt.err (!%p1407_p0)
}
 0x26a   : > { %s1480_s21 = smov 128   ;;  %s1481_s26 = smov 8   ;;  %v1016_v16 = vsub.f32 %v1014_v14, %v920_v9  ;;  %1021 = vst.msk [vmem:[%s1675_s25 + $0x8] sm:$0xff] %vm766_vm1, %v1017_v15 }
 0x26b   : > { %s1782_s28 = scalar_lea.sflag [#allocation3], %s1661_s27  ;;  %s1783_s29 = sshll.u32 %s1554_s13, 8 }
 0x26c   : > { %1336 = dma.vmem_to_hbm [thread:$0]  (%p1571_p5), %s1665_s17, 256, %s1672_s24, %s1782_s28, %s1480_s21, %s1480_s21, %s1481_s26  }
 0x26d   : > { %s1711_s22 = scalar_lea.hbm %s1774_s9, %s1783_s29  ;;  %s1784_s23 = sshll.u32 %s1675_s25, 4  ;;  %1020 = vst.msk [vmem:[%s1675_s25] sm:$0xff] %vm766_vm1, %v1016_v16  ;;  %s1715_s23 = int_to_ptr.vmem [resolvable:$true] %s1784_s23 }
 0x26e   : > { %s1028_s0 = scalar_lea.sflag [#allocation5], %s1661_s27  ;;  %s1411_s1 = scalar_lea.vmem %s1715_s23, 256 }
 0x26f   : > { %p1412_p1 = scmp.ne.s32.totalorder %s1715_s23, %s1411_s1  ;;  %s1482_s13 = smov [#allocation4]  }
 0x270   : > { %s1415_s17 = sshll.u32 %s1482_s13, 4  ;;  %s1416_s17 = int_to_ptr.vmem [resolvable:$false] %s1415_s17 }
 0x271   : > { %p1413_p2 = pnand %p1412_p1, %p1571_p5  ;;  %s1417_s24 = scalar_lea.vmem %s1416_s17, 512 }
 0x272   : > { %p1418_p4 = scmp.lt.s32.totalorder %s1715_s23, %s1416_s17  ;;  %p1419_p7 = scmp.lt.s32.totalorder %s1417_s24, %s1411_s1 }
 0x273   : > { %p1414_p3 = pneg %p1413_p2 }
 0x274   : > { %p1420_p8 = por %p1419_p7, %p1418_p4 }
 0x276   : > { %p1421_p9 = pnand %p1420_p8, %p1414_p3 }
 0x278   : > { %1424 = shalt.err (!%p1421_p9)
}
 0x279   : > { %s1425_s25 = scalar_lea.hbm %s1711_s22, 256  ;;  %s1429_s14 = scalar_lea.hbm %s1774_s9, 512 }
 0x27a   : > { %p1426_p10 = scmp.ne.s32.totalorder %s1711_s22, %s1425_s25  ;;  %p1430_p13 = scmp.lt.u32.totalorder %s1711_s22, %s1774_s9 }
 0x27b   : > { %p1431_p0 = scmp.lt.u32.totalorder %s1429_s14, %s1425_s25  ;;  %p1433_p2 = scmp.lt.u32.totalorder %s1425_s25, %s1711_s22 }
 0x27c   : > { %p1427_p11 = pnand %p1426_p10, %p1571_p5 }
 0x27d   : > { %p1432_p1 = por %p1431_p0, %p1430_p13 }
 0x27e   : > { %p1428_p12 = pneg %p1427_p11 }
 0x27f   : > { %p1434_p3 = por %p1433_p2, %p1432_p1 }
 0x281   : > { %p1435_p4 = pnand %p1434_p3, %p1428_p12 }
 0x283   : > { %1438 = shalt.err (!%p1435_p4)
}
 0x284   : > { %1337 = dma.vmem_to_hbm [thread:$0]  (%p1571_p5), %s1715_s23, 256, %s1711_s22, %s1028_s0, %s1480_s21, %s1480_s21, %s1481_s26  }
 0x285 PF: > { %p1347_p7 = scmp.ge.s32.totalorder %s1477_s12, 2  ;;  %s1072_s1 = sand.u32 1, %s1465_s30  }
 0x286   : > { %s1073_s17 = scalar_lea.sflag [#allocation3], %s1072_s1 }
 0x287   : > { %p1341_p8 = pnand %p1347_p7, %p1575_p6 }
 0x289   : > { %1456 = dma.done.wait (!%p1341_p8), %s1073_s17, 256  }
 0x28a   : > { %1458 = vsyncadd (!%p1341_p8), %s1073_s17, 4294967040  ;;  %s1082_s19 = scalar_lea.sflag [#allocation5], %s1072_s1 }
 0x28b   : > { %1460 = dma.done.wait (!%p1341_p8), %s1082_s19, 256  }
 0x28c   : > { %1462 = vsyncadd (!%p1341_p8), %s1082_s19, 4294967040  ;;  %p23_p5 = scmp.ge.s32.totalorder %s1558_s15, 4   ;;  %s1785_s30 = smov %s1469_s10 }
 0x28d   : > { %s1786_s10 = smov %s1473_s11  ;;  %s1787_s11 = smov %s1569_s18 }
 0x28e   : > { %s1788_s12 = smov %s1558_s15  ;;  %25 = sbr.rel (!%p23_p5) target bundleno = 8 (0x8), region = 107 }
 0x295   :  { %1087 = vsyncpa [#allocation3], 1 }
 0x296   :  { %1089 = vsyncpa [#allocation3 + $0x1], 1 }
 0x297   :  { %1090 = vsyncpa [#allocation5], 1 }
 0x298   :  { %1092 = vsyncpa [#allocation5 + $0x1], 1 }

</bundles_post_ra>
